<compile_context>
chip_gen: v7x
topology: tpu7x:2x2x1
jax: 0.10.0
libtpu: 0.0.40
codegen_flags: <defaults>
</compile_context>

<pallas_src>
import math
import functools

import jax
import jax.numpy as jnp
from jax import lax
from jax.experimental import pallas as pl
from jax.experimental.pallas import tpu as pltpu


_NEG_BIG = -1e30  # finite "-inf": exp() underflows to 0, no (-inf)-(-inf) NaN


# --------------------------------------------------------------------------- #
# Pass 1: fused, head-major Q/K/V projection (runs once per token).
# --------------------------------------------------------------------------- #
def _qkv_proj_kernel(x_ref, wqkv_ref, q_ref, k_ref, v_ref, *, n_heads, head_size):
    nh, hs = n_heads, head_size
    x = x_ref[0]                                                    # (tp, C)
    # One wide MXU matmul against the [Wq|Wk|Wv] slab (full MXU N width).
    qkv = jnp.dot(x, wqkv_ref[...], preferred_element_type=jnp.float32)
    # The head-major layout is produced ONCE here, outside the O(T^2) hot
    # loop, so the attention kernel never lane-slices per head.
    for h in range(nh):
        q_ref[0, h] = qkv[:, h * hs:(h + 1) * hs].astype(q_ref.dtype)
        k_ref[0, h] = qkv[:, (nh + h) * hs:(nh + h + 1) * hs].astype(k_ref.dtype)
        v_ref[0, h] = qkv[:, (2 * nh + h) * hs:(2 * nh + h + 1) * hs].astype(v_ref.dtype)


# --------------------------------------------------------------------------- #
# Pass 2: flash attention on head-major Q/K/V + fused output projection.
# --------------------------------------------------------------------------- #
def _flash_kernel(qi_tbl, ki_tbl, q_ref, k_ref, v_ref, wo_ref, bo_ref, o_ref,
                  m_scr, l_scr, acc_scr, *, n_heads, tq, tkv, n_kv, masked):
    nh = n_heads
    p = pl.program_id(1)
    qi = qi_tbl[p]
    ki = ki_tbl[p]

    # ---- first kv step of this q tile: reset the online-softmax state. ----
    @pl.when(ki == 0)
    def _init():
        m_scr[...] = jnp.full(m_scr.shape, -jnp.inf, dtype=m_scr.dtype)
        l_scr[...] = jnp.zeros(l_scr.shape, dtype=l_scr.dtype)
        acc_scr[...] = jnp.zeros(acc_scr.shape, dtype=acc_scr.dtype)

    # ---- one kv tile: head-batched online-softmax update. ----
    def _accumulate(diag_masked):
        q = q_ref[0]                                                # (nh, tq, hs)
        k = k_ref[0]                                                # (nh, tkv, hs)
        v = v_ref[0]                                                # (nh, tkv, hs)
        s = jnp.einsum('htd,hkd->htk', q, k,
                       preferred_element_type=jnp.float32)          # (nh, tq, tkv)
        if diag_masked:
            # Only the diagonal tile needs masking (tq == tkv); interior tiles
            # skip these iota/compare/select/add VPU ops entirely.
            rows = lax.broadcasted_iota(jnp.int32, (tq, tkv), 0)
            cols = lax.broadcasted_iota(jnp.int32, (tq, tkv), 1)
            s = s + jnp.where(rows >= cols, 0.0, _NEG_BIG)[None, :, :]
        m_new = jnp.maximum(m_scr[...], jnp.max(s, axis=-1, keepdims=True))
        alpha = jnp.exp(m_scr[...] - m_new)
        pexp = jnp.exp(s - m_new)
        l_scr[...] = alpha * l_scr[...] + jnp.sum(pexp, axis=-1, keepdims=True)
        acc_scr[...] = alpha * acc_scr[...] + jnp.einsum(
            'htk,hkd->htd', pexp.astype(v.dtype), v,
            preferred_element_type=jnp.float32)
        m_scr[...] = m_new

    if masked:
        # Triangular pair grid => ki <= qi always; only ki == qi needs a mask.
        pl.when(ki == qi)(lambda: _accumulate(True))
        pl.when(ki < qi)(lambda: _accumulate(False))
    else:
        _accumulate(False)

    # ---- last kv step of this q tile: normalize, merge heads, output proj. --
    last_ki = qi if masked else n_kv - 1

    @pl.when(ki == last_ki)
    def _finalize():
        inv_l = pl.reciprocal(l_scr[...], approx=True)              # EUP slot
        heads = acc_scr[...] * inv_l                                # (nh, tq, hs)
        # Head merge happens once per q tile (outside the kv loop).  A single
        # full-depth (K = nh*hs) matmul here keeps the MXU contraction deep,
        # which beats nh shallow (K = hs) per-head matmuls; the lane-concat
        # cost is O(tq*C) once per q tile and is negligible vs. the matmul.
        concat = jnp.concatenate([heads[h] for h in range(nh)], axis=-1)
        out = jnp.dot(concat.astype(wo_ref.dtype), wo_ref[...],
                      preferred_element_type=jnp.float32)
        out = out + bo_ref[...]
        o_ref[0] = out.astype(o_ref.dtype)


# --------------------------------------------------------------------------- #
# Wrapper helpers.
# --------------------------------------------------------------------------- #
def _pick_seq_tile(T, cap):
    """Largest power-of-two tile <= cap that divides T; else the full T."""
    t = cap
    while t >= 8:
        if T % t == 0:
            return t
        t //= 2
    return T


def _vmem_budget_bytes():
    """Generation-aware scoped-VMEM request: physical capacity minus headroom."""
    cap = 128 * 1024 * 1024
    try:
        info = pltpu.get_tpu_info()
        cap = int(getattr(info, "vmem_capacity_bytes", cap))
    except Exception:
        pass
    # Leave ~25% for compiler-internal scratch and un-accounted f32 temporaries
    # (s, pexp, qkv); never ask for more than ~100 MiB even on 128 MiB parts.
    # => ~48 MiB on v7x (64 MiB physical), ~96-100 MiB on v5e/v6e.
    return min((cap * 3) // 4, 100 * 1024 * 1024)


def _maybe_single_buffered(block_shape, index_map):
    """BlockSpec for constant-index (weight) blocks.

    Their index_map never changes, so double-buffering only doubles VMEM;
    request a single buffer where the running JAX supports pipeline_mode.
    """
    try:
        return pl.BlockSpec(block_shape, index_map, pipeline_mode=pl.Buffered(1))
    except Exception:  # older JAX without pipeline_mode / Buffered
        return pl.BlockSpec(block_shape, index_map)


# --------------------------------------------------------------------------- #
# Public entry point.
# --------------------------------------------------------------------------- #
def multihead_attention(x, wq, wk, wv, wo, bo, *, n_heads, head_size, masked,
                        seq_tile=None):
    """x: (B, T, C); wq/wk/wv: (C, nh*hs); wo: (nh*hs, C); bo: (1, C)."""
    B, T, C = x.shape
    nh, hs = n_heads, head_size
    nh_hs = nh * hs
    assert wq.shape == (C, nh_hs) and wk.shape == (C, nh_hs) and wv.shape == (C, nh_hs)
    assert wo.shape == (nh_hs, C) and bo.shape == (1, C)

    budget = _vmem_budget_bytes()
    tile_cap = 512 if budget >= 80 * 1024 * 1024 else 256
    tq = seq_tile if seq_tile is not None else _pick_seq_tile(T, tile_cap)
    tkv = tq                  # tq == tkv keeps diagonal-mask / finalize logic valid
    assert T % tq == 0
    nq = nk = T // tq

    itemsize = x.dtype.itemsize
    wsz = wq.dtype.itemsize

    # Fold the 1/sqrt(d_model) score scaling into Wq (exact, zero runtime cost).
    scale = 1.0 / math.sqrt(C)
    wqkv = jnp.concatenate([wq * scale, wk, wv], axis=1)            # (C, 3*nh*hs)

    # ----------------------- Pass 1: Q/K/V projection ----------------------- #
    proj_kernel = functools.partial(_qkv_proj_kernel, n_heads=nh, head_size=hs)
    qkv_struct = jax.ShapeDtypeStruct((B, nh, T, hs), x.dtype)
    proj_flops = 2 * B * T * C * 3 * nh_hs
    proj_bytes = (B * T * C * itemsize + wqkv.size * wsz
                  + 3 * B * T * nh_hs * itemsize)

    q, k, v = pl.pallas_call(
        proj_kernel,
        out_shape=(qkv_struct, qkv_struct, qkv_struct),
        grid_spec=pltpu.PrefetchScalarGridSpec(
            num_scalar_prefetch=0,
            grid=(B, nq),
            in_specs=[
                pl.BlockSpec((1, tq, C), lambda b, i: (b, i, 0)),            # x tile
                _maybe_single_buffered((C, 3 * nh_hs), lambda b, i: (0, 0)),  # [Wq|Wk|Wv]
            ],
            out_specs=(
                pl.BlockSpec((1, nh, tq, hs), lambda b, i: (b, 0, i, 0)),    # Q
                pl.BlockSpec((1, nh, tq, hs), lambda b, i: (b, 0, i, 0)),    # K
                pl.BlockSpec((1, nh, tq, hs), lambda b, i: (b, 0, i, 0)),    # V
            )),
        compiler_params=pltpu.CompilerParams(
            dimension_semantics=("parallel", "parallel"),
            vmem_limit_bytes=int(budget)),
        cost_estimate=pl.CostEstimate(
            flops=int(proj_flops), transcendentals=0,
            bytes_accessed=int(proj_bytes)),
    )(x, wqkv)

    # ------------------ Pass 2: flash attention + out proj ------------------ #
    # Causal: fold the triangular (qi, ki) structure into one scalar-prefetched
    # pair axis so dead kv tiles are never fetched nor visited.
    if masked:
        pairs = [(qq, kk) for qq in range(nq) for kk in range(qq + 1)]
    else:
        pairs = [(qq, kk) for qq in range(nq) for kk in range(nk)]
    qi_tbl = jnp.asarray([pq for pq, _ in pairs], dtype=jnp.int32)
    ki_tbl = jnp.asarray([pk for _, pk in pairs], dtype=jnp.int32)
    n_pairs = len(pairs)

    flash_kernel = functools.partial(
        _flash_kernel, n_heads=nh, tq=tq, tkv=tkv, n_kv=nk, masked=masked)

    attn_flops = (4 * B * n_pairs * nh * tq * tkv * hs          # QK^T and P@V
                  + 2 * B * T * nh_hs * C)                      # output projection
    attn_trans = B * n_pairs * nh * tq * tkv                    # softmax exp
    attn_bytes = (B * nq * nh * tq * hs * itemsize              # Q (once per q tile)
                  + 2 * B * n_pairs * nh * tkv * hs * itemsize  # K, V (per pair)
                  + (wo.size + bo.size) * wsz
                  + B * T * C * itemsize)                       # output

    out = pl.pallas_call(
        flash_kernel,
        out_shape=jax.ShapeDtypeStruct((B, T, C), x.dtype),
        grid_spec=pltpu.PrefetchScalarGridSpec(
            num_scalar_prefetch=2,                               # qi_tbl, ki_tbl
            grid=(B, n_pairs),
            in_specs=[
                pl.BlockSpec((1, nh, tq, hs),
                             lambda b, p, qt, kt: (b, 0, qt[p], 0)),   # Q tile
                pl.BlockSpec((1, nh, tkv, hs),
                             lambda b, p, qt, kt: (b, 0, kt[p], 0)),   # K tile
                pl.BlockSpec((1, nh, tkv, hs),
                             lambda b, p, qt, kt: (b, 0, kt[p], 0)),   # V tile
                _maybe_single_buffered((nh_hs, C),
                                       lambda b, p, qt, kt: (0, 0)),   # Wo
                _maybe_single_buffered((1, C),
                                       lambda b, p, qt, kt: (0, 0)),   # bo
            ],
            out_specs=pl.BlockSpec((1, tq, C),
                                   lambda b, p, qt, kt: (b, qt[p], 0)),
            scratch_shapes=[
                pltpu.VMEM((nh, tq, 1), jnp.float32),            # running max
                pltpu.VMEM((nh, tq, 1), jnp.float32),            # running sum
                pltpu.VMEM((nh, tq, hs), jnp.float32),           # output accumulator
            ]),
        compiler_params=pltpu.CompilerParams(
            dimension_semantics=("parallel", "arbitrary"),
            vmem_limit_bytes=int(budget)),
        cost_estimate=pl.CostEstimate(
            flops=int(attn_flops), transcendentals=int(attn_trans),
            bytes_accessed=int(attn_bytes)),
    )(qi_tbl, ki_tbl, q, k, v, wo, bo)
    return out


# --------------------------------------------------------------------------- #
# Pure-JAX reference mirroring the PyTorch forward (dropout = identity).
# --------------------------------------------------------------------------- #
def _reference(x, wq, wk, wv, wo, bo, tril, *, n_heads, head_size, masked):
    B, T, C = x.shape
    outs = []
    for h in range(n_heads):
        sl = slice(h * head_size, (h + 1) * head_size)
        q = x @ wq[:, sl]
        k = x @ wk[:, sl]
        v = x @ wv[:, sl]
        wei = (q @ jnp.swapaxes(k, -2, -1)) / math.sqrt(C)
        if masked:
            wei = jnp.where(tril[:T, :T] == 0.0, -jnp.inf, wei)
        wei = jax.nn.softmax(wei, axis=-1)
        outs.append(wei @ v)
    cat = jnp.concatenate(outs, axis=-1)
    return cat @ wo + bo


if __name__ == "__main__":
    # Small shapes consistent with the module.
    B, T = 2, 8
    d_model = 32
    n_heads = 4
    head_size = 8
    block_size = 8

    key = jax.random.PRNGKey(0)
    kx, kq, kk, kv, ko, kb = jax.random.split(key, 6)

    x = jax.random.normal(kx, (B, T, d_model), dtype=jnp.float32)

    # Deterministic parameter init (nn.Linear weights stored pre-transposed so
    # y = x @ W; per-head weights stacked along the output-feature axis).
    w_scale = 0.02
    wq = w_scale * jax.random.normal(kq, (d_model, n_heads * head_size), jnp.float32)
    wk = w_scale * jax.random.normal(kk, (d_model, n_heads * head_size), jnp.float32)
    wv = w_scale * jax.random.normal(kv, (d_model, n_heads * head_size), jnp.float32)
    wo = w_scale * jax.random.normal(ko, (n_heads * head_size, d_model), jnp.float32)
    bo = w_scale * jax.random.normal(kb, (1, d_model), jnp.float32)

    tril = jnp.tril(jnp.ones((block_size, block_size), dtype=jnp.float32))[:T, :T]

    for masked in (True, False):
        out = multihead_attention(x, wq, wk, wv, wo, bo,
                                  n_heads=n_heads, head_size=head_size,
                                  masked=masked)
        out = jax.block_until_ready(out)
        ref = _reference(x, wq, wk, wv, wo, bo, tril,
                         n_heads=n_heads, head_size=head_size, masked=masked)
        assert out.shape == (B, T, d_model)
        # Tolerance allows the approx (EUP) reciprocal in the softmax epilogue.
        assert jnp.allclose(out, ref, atol=2e-3, rtol=2e-2), \
            f"mismatch vs JAX reference (masked={masked})"

    print("KERNEL_OK")
</pallas_src>

<mosaic_0001>
module attributes {stable_mosaic.version = 11 : i64} {
  func.func @_qkv_proj_kernel(%arg0: i32, %arg1: i32, %arg2: memref<1x8x32xf32, #tpu.memory_space<vmem>>, %arg3: memref<32x96xf32, #tpu.memory_space<vmem>>, %arg4: memref<1x4x8x8xf32, #tpu.memory_space<vmem>>, %arg5: memref<1x4x8x8xf32, #tpu.memory_space<vmem>>, %arg6: memref<1x4x8x8xf32, #tpu.memory_space<vmem>>) attributes {dimension_semantics = [#tpu.dimension_semantics<parallel>, #tpu.dimension_semantics<parallel>], iteration_bounds = array<i64: 2, 1>, scalar_prefetch = 0 : i64, scratch_operands = 0 : i64, tpu.core_type = #tpu.core_type<tc>, window_params = [{transform_indices = @transform_0, window_bounds = array<i64: 1, 8, 32>}, {pipeline_mode = #tpu.pipeline_mode<synchronous>, transform_indices = @transform_1, window_bounds = array<i64: 32, 96>}, {transform_indices = @transform_2, window_bounds = array<i64: 1, 4, 8, 8>}, {transform_indices = @transform_3, window_bounds = array<i64: 1, 4, 8, 8>}, {transform_indices = @transform_4, window_bounds = array<i64: 1, 4, 8, 8>}]} {
    %c0 = arith.constant 0 : index
    %c0_0 = arith.constant 0 : index
    %c0_1 = arith.constant 0 : index
    %0 = vector.load %arg2[%c0, %c0_0, %c0_1] : memref<1x8x32xf32, #tpu.memory_space<vmem>>, vector<1x8x32xf32>
    %1 = vector.shape_cast %0 : vector<1x8x32xf32> to vector<8x32xf32>
    %c0_2 = arith.constant 0 : index
    %c0_3 = arith.constant 0 : index
    %2 = vector.load %arg3[%c0_2, %c0_3] : memref<32x96xf32, #tpu.memory_space<vmem>>, vector<32x96xf32>
    %cst = arith.constant dense<0.000000e+00> : vector<8x96xf32>
    %3 = tpu.matmul %1, %2, %cst {dimension_numbers = #tpu.dot_dimension_numbers<[1], [0], [0], [1], [0, 0, 1, 1], [], []>} : vector<8x32xf32>, vector<32x96xf32>, vector<8x96xf32> -> vector<8x96xf32>
    %4 = vector.extract_strided_slice %3 {offsets = [0, 0], sizes = [8, 8], strides = [1, 1]} : vector<8x96xf32> to vector<8x8xf32>
    %c0_4 = arith.constant 0 : index
    %c0_5 = arith.constant 0 : index
    %c0_6 = arith.constant 0 : index
    %c0_7 = arith.constant 0 : index
    %5 = vector.load %arg4[%c0_4, %c0_5, %c0_6, %c0_7] : memref<1x4x8x8xf32, #tpu.memory_space<vmem>>, vector<1x1x8x8xf32>
    %6 = vector.shape_cast %5 : vector<1x1x8x8xf32> to vector<8x8xf32>
    %7 = vector.shape_cast %4 : vector<8x8xf32> to vector<1x1x8x8xf32>
    tpu.vector_store %arg4[%c0_4, %c0_5, %c0_6, %c0_7], %7 {strides = array<i32>} : memref<1x4x8x8xf32, #tpu.memory_space<vmem>>, vector<1x1x8x8xf32>,
    %8 = vector.extract_strided_slice %3 {offsets = [0, 32], sizes = [8, 8], strides = [1, 1]} : vector<8x96xf32> to vector<8x8xf32>
    %c0_8 = arith.constant 0 : index
    %c0_9 = arith.constant 0 : index
    %c0_10 = arith.constant 0 : index
    %c0_11 = arith.constant 0 : index
    %9 = vector.load %arg5[%c0_8, %c0_9, %c0_10, %c0_11] : memref<1x4x8x8xf32, #tpu.memory_space<vmem>>, vector<1x1x8x8xf32>
    %10 = vector.shape_cast %9 : vector<1x1x8x8xf32> to vector<8x8xf32>
    %11 = vector.shape_cast %8 : vector<8x8xf32> to vector<1x1x8x8xf32>
    tpu.vector_store %arg5[%c0_8, %c0_9, %c0_10, %c0_11], %11 {strides = array<i32>} : memref<1x4x8x8xf32, #tpu.memory_space<vmem>>, vector<1x1x8x8xf32>,
    %12 = vector.extract_strided_slice %3 {offsets = [0, 64], sizes = [8, 8], strides = [1, 1]} : vector<8x96xf32> to vector<8x8xf32>
    %c0_12 = arith.constant 0 : index
    %c0_13 = arith.constant 0 : index
    %c0_14 = arith.constant 0 : index
    %c0_15 = arith.constant 0 : index
    %13 = vector.load %arg6[%c0_12, %c0_13, %c0_14, %c0_15] : memref<1x4x8x8xf32, #tpu.memory_space<vmem>>, vector<1x1x8x8xf32>
    %14 = vector.shape_cast %13 : vector<1x1x8x8xf32> to vector<8x8xf32>
    %15 = vector.shape_cast %12 : vector<8x8xf32> to vector<1x1x8x8xf32>
    tpu.vector_store %arg6[%c0_12, %c0_13, %c0_14, %c0_15], %15 {strides = array<i32>} : memref<1x4x8x8xf32, #tpu.memory_space<vmem>>, vector<1x1x8x8xf32>,
    %16 = vector.extract_strided_slice %3 {offsets = [0, 8], sizes = [8, 8], strides = [1, 1]} : vector<8x96xf32> to vector<8x8xf32>
    %c0_16 = arith.constant 0 : index
    %c1 = arith.constant 1 : index
    %c0_17 = arith.constant 0 : index
    %c0_18 = arith.constant 0 : index
    %17 = vector.load %arg4[%c0_16, %c1, %c0_17, %c0_18] : memref<1x4x8x8xf32, #tpu.memory_space<vmem>>, vector<1x1x8x8xf32>
    %18 = vector.shape_cast %17 : vector<1x1x8x8xf32> to vector<8x8xf32>
    %19 = vector.shape_cast %16 : vector<8x8xf32> to vector<1x1x8x8xf32>
    tpu.vector_store %arg4[%c0_16, %c1, %c0_17, %c0_18], %19 {strides = array<i32>} : memref<1x4x8x8xf32, #tpu.memory_space<vmem>>, vector<1x1x8x8xf32>,
    %20 = vector.extract_strided_slice %3 {offsets = [0, 40], sizes = [8, 8], strides = [1, 1]} : vector<8x96xf32> to vector<8x8xf32>
    %c0_19 = arith.constant 0 : index
    %c1_20 = arith.constant 1 : index
    %c0_21 = arith.constant 0 : index
    %c0_22 = arith.constant 0 : index
    %21 = vector.load %arg5[%c0_19, %c1_20, %c0_21, %c0_22] : memref<1x4x8x8xf32, #tpu.memory_space<vmem>>, vector<1x1x8x8xf32>
    %22 = vector.shape_cast %21 : vector<1x1x8x8xf32> to vector<8x8xf32>
    %23 = vector.shape_cast %20 : vector<8x8xf32> to vector<1x1x8x8xf32>
    tpu.vector_store %arg5[%c0_19, %c1_20, %c0_21, %c0_22], %23 {strides = array<i32>} : memref<1x4x8x8xf32, #tpu.memory_space<vmem>>, vector<1x1x8x8xf32>,
    %24 = vector.extract_strided_slice %3 {offsets = [0, 72], sizes = [8, 8], strides = [1, 1]} : vector<8x96xf32> to vector<8x8xf32>
    %c0_23 = arith.constant 0 : index
    %c1_24 = arith.constant 1 : index
    %c0_25 = arith.constant 0 : index
    %c0_26 = arith.constant 0 : index
    %25 = vector.load %arg6[%c0_23, %c1_24, %c0_25, %c0_26] : memref<1x4x8x8xf32, #tpu.memory_space<vmem>>, vector<1x1x8x8xf32>
    %26 = vector.shape_cast %25 : vector<1x1x8x8xf32> to vector<8x8xf32>
    %27 = vector.shape_cast %24 : vector<8x8xf32> to vector<1x1x8x8xf32>
    tpu.vector_store %arg6[%c0_23, %c1_24, %c0_25, %c0_26], %27 {strides = array<i32>} : memref<1x4x8x8xf32, #tpu.memory_space<vmem>>, vector<1x1x8x8xf32>,
    %28 = vector.extract_strided_slice %3 {offsets = [0, 16], sizes = [8, 8], strides = [1, 1]} : vector<8x96xf32> to vector<8x8xf32>
    %c0_27 = arith.constant 0 : index
    %c2 = arith.constant 2 : index
    %c0_28 = arith.constant 0 : index
    %c0_29 = arith.constant 0 : index
    %29 = vector.load %arg4[%c0_27, %c2, %c0_28, %c0_29] : memref<1x4x8x8xf32, #tpu.memory_space<vmem>>, vector<1x1x8x8xf32>
    %30 = vector.shape_cast %29 : vector<1x1x8x8xf32> to vector<8x8xf32>
    %31 = vector.shape_cast %28 : vector<8x8xf32> to vector<1x1x8x8xf32>
    tpu.vector_store %arg4[%c0_27, %c2, %c0_28, %c0_29], %31 {strides = array<i32>} : memref<1x4x8x8xf32, #tpu.memory_space<vmem>>, vector<1x1x8x8xf32>,
    %32 = vector.extract_strided_slice %3 {offsets = [0, 48], sizes = [8, 8], strides = [1, 1]} : vector<8x96xf32> to vector<8x8xf32>
    %c0_30 = arith.constant 0 : index
    %c2_31 = arith.constant 2 : index
    %c0_32 = arith.constant 0 : index
    %c0_33 = arith.constant 0 : index
    %33 = vector.load %arg5[%c0_30, %c2_31, %c0_32, %c0_33] : memref<1x4x8x8xf32, #tpu.memory_space<vmem>>, vector<1x1x8x8xf32>
    %34 = vector.shape_cast %33 : vector<1x1x8x8xf32> to vector<8x8xf32>
    %35 = vector.shape_cast %32 : vector<8x8xf32> to vector<1x1x8x8xf32>
    tpu.vector_store %arg5[%c0_30, %c2_31, %c0_32, %c0_33], %35 {strides = array<i32>} : memref<1x4x8x8xf32, #tpu.memory_space<vmem>>, vector<1x1x8x8xf32>,
    %36 = vector.extract_strided_slice %3 {offsets = [0, 80], sizes = [8, 8], strides = [1, 1]} : vector<8x96xf32> to vector<8x8xf32>
    %c0_34 = arith.constant 0 : index
    %c2_35 = arith.constant 2 : index
    %c0_36 = arith.constant 0 : index
    %c0_37 = arith.constant 0 : index
    %37 = vector.load %arg6[%c0_34, %c2_35, %c0_36, %c0_37] : memref<1x4x8x8xf32, #tpu.memory_space<vmem>>, vector<1x1x8x8xf32>
    %38 = vector.shape_cast %37 : vector<1x1x8x8xf32> to vector<8x8xf32>
    %39 = vector.shape_cast %36 : vector<8x8xf32> to vector<1x1x8x8xf32>
    tpu.vector_store %arg6[%c0_34, %c2_35, %c0_36, %c0_37], %39 {strides = array<i32>} : memref<1x4x8x8xf32, #tpu.memory_space<vmem>>, vector<1x1x8x8xf32>,
    %40 = vector.extract_strided_slice %3 {offsets = [0, 24], sizes = [8, 8], strides = [1, 1]} : vector<8x96xf32> to vector<8x8xf32>
    %c0_38 = arith.constant 0 : index
    %c3 = arith.constant 3 : index
    %c0_39 = arith.constant 0 : index
    %c0_40 = arith.constant 0 : index
    %41 = vector.load %arg4[%c0_38, %c3, %c0_39, %c0_40] : memref<1x4x8x8xf32, #tpu.memory_space<vmem>>, vector<1x1x8x8xf32>
    %42 = vector.shape_cast %41 : vector<1x1x8x8xf32> to vector<8x8xf32>
    %43 = vector.shape_cast %40 : vector<8x8xf32> to vector<1x1x8x8xf32>
    tpu.vector_store %arg4[%c0_38, %c3, %c0_39, %c0_40], %43 {strides = array<i32>} : memref<1x4x8x8xf32, #tpu.memory_space<vmem>>, vector<1x1x8x8xf32>,
    %44 = vector.extract_strided_slice %3 {offsets = [0, 56], sizes = [8, 8], strides = [1, 1]} : vector<8x96xf32> to vector<8x8xf32>
    %c0_41 = arith.constant 0 : index
    %c3_42 = arith.constant 3 : index
    %c0_43 = arith.constant 0 : index
    %c0_44 = arith.constant 0 : index
    %45 = vector.load %arg5[%c0_41, %c3_42, %c0_43, %c0_44] : memref<1x4x8x8xf32, #tpu.memory_space<vmem>>, vector<1x1x8x8xf32>
    %46 = vector.shape_cast %45 : vector<1x1x8x8xf32> to vector<8x8xf32>
    %47 = vector.shape_cast %44 : vector<8x8xf32> to vector<1x1x8x8xf32>
    tpu.vector_store %arg5[%c0_41, %c3_42, %c0_43, %c0_44], %47 {strides = array<i32>} : memref<1x4x8x8xf32, #tpu.memory_space<vmem>>, vector<1x1x8x8xf32>,
    %48 = vector.extract_strided_slice %3 {offsets = [0, 88], sizes = [8, 8], strides = [1, 1]} : vector<8x96xf32> to vector<8x8xf32>
    %c0_45 = arith.constant 0 : index
    %c3_46 = arith.constant 3 : index
    %c0_47 = arith.constant 0 : index
    %c0_48 = arith.constant 0 : index
    %49 = vector.load %arg6[%c0_45, %c3_46, %c0_47, %c0_48] : memref<1x4x8x8xf32, #tpu.memory_space<vmem>>, vector<1x1x8x8xf32>
    %50 = vector.shape_cast %49 : vector<1x1x8x8xf32> to vector<8x8xf32>
    %51 = vector.shape_cast %48 : vector<8x8xf32> to vector<1x1x8x8xf32>
    tpu.vector_store %arg6[%c0_45, %c3_46, %c0_47, %c0_48], %51 {strides = array<i32>} : memref<1x4x8x8xf32, #tpu.memory_space<vmem>>, vector<1x1x8x8xf32>,
    return
  }
  func.func @transform_0(%arg0: i32, %arg1: i32) -> (i32, i32, i32) {
    %c0_i32 = arith.constant 0 : i32
    %c0_i32_0 = arith.constant 0 : i32
    return %arg0, %arg1, %c0_i32 : i32, i32, i32
  }
  func.func @transform_1(%arg0: i32, %arg1: i32) -> (i32, i32) {
    %c0_i32 = arith.constant 0 : i32
    %c0_i32_0 = arith.constant 0 : i32
    %c0_i32_1 = arith.constant 0 : i32
    return %c0_i32, %c0_i32_0 : i32, i32
  }
  func.func @transform_2(%arg0: i32, %arg1: i32) -> (i32, i32, i32, i32) {
    %c0_i32 = arith.constant 0 : i32
    %c0_i32_0 = arith.constant 0 : i32
    %c0_i32_1 = arith.constant 0 : i32
    return %arg0, %c0_i32, %arg1, %c0_i32_0 : i32, i32, i32, i32
  }
  func.func @transform_3(%arg0: i32, %arg1: i32) -> (i32, i32, i32, i32) {
    %c0_i32 = arith.constant 0 : i32
    %c0_i32_0 = arith.constant 0 : i32
    %c0_i32_1 = arith.constant 0 : i32
    return %arg0, %c0_i32, %arg1, %c0_i32_0 : i32, i32, i32, i32
  }
  func.func @transform_4(%arg0: i32, %arg1: i32) -> (i32, i32, i32, i32) {
    %c0_i32 = arith.constant 0 : i32
    %c0_i32_0 = arith.constant 0 : i32
    %c0_i32_1 = arith.constant 0 : i32
    return %arg0, %c0_i32, %arg1, %c0_i32_0 : i32, i32, i32, i32
  }
}

</mosaic_0001>

<bundles_post_ra>
// kernel: tpu_custom_call.1
= control target key start
LH: loop header
LB: loop body
LE: loop exit
PB: predicated region body
PF: predicated region fallthrough
CT: control target
= control target key end

     0   :  { %10 = vsyncpa [#allocation3], 0  ;;  %s1359_s0 = inlined_call_operand.hbm [shape: f32[2,8,32], index: 0, kind: input, shape index: {}]   ;;  %s1360_s1 = inlined_call_operand.hbm [shape: f32[32,96], index: 1, kind: input, shape index: {}]   ;;  %s1361_s2 = inlined_call_operand.hbm [shape: f32[2,4,8,8], index: 2, kind: output, shape index: {0}]   ;;  %s1362_s3 = inlined_call_operand.hbm [shape: f32[2,4,8,8], index: 3, kind: output, shape index: {1}]   ;;  %s1363_s4 = inlined_call_operand.hbm [shape: f32[2,4,8,8], index: 4, kind: output, shape index: {2}]  }
   0x1   :  { %12 = vsyncpa [#allocation3 + $0x1], 0 }
   0x2   :  { %13 = vsyncpa [#allocation6], 0 }
   0x3   :  { %14 = vsyncpa [#allocation4], 0 }
   0x4   :  { %16 = vsyncpa [#allocation4 + $0x1], 0 }
   0x5   :  { %17 = vsyncpa [#allocation9], 0 }
   0x6   :  { %19 = vsyncpa [#allocation9 + $0x1], 0  ;;  %s1034_s15 = smov 0   ;;  %s1036_s16 = smov 0  }
   0x7   :  { %s1038_s17 = smov 0   ;;  %s1040_s18 = smov 0  }
   0x8   :  { %s1042_s19 = smov 0   ;;  %s1044_s20 = smov 0  }
   0x9 LB: > { %s1065_s21 = sadd.s32 4294967295, %s984_s20   ;;  %s1367_s22 = sadd.s32 4294967294, %s984_s20   ;;  %s984_s20 = sphi %s1044_s20, %s25_s20   ;;  %s980_s19 = sphi %s1042_s19, %s1388_s19   ;;  %s976_s18 = sphi %s1040_s18, %s1387_s18   ;;  %s972_s17 = sphi %s1038_s17, %s1386_s17   ;;  %s968_s16 = sphi %s1036_s16, %s1385_s16   ;;  %s964_s15 = sphi %s1034_s15, %s1384_s15  }
   0xa   : > { %p59_p0 = scmp.ne.s32.totalorder %s968_s16, %s964_s15  ;;  %p1364_p1 = scmp.eq.s32.totalorder %s1065_s21, 0 }
   0xb   : > { %p112_p3 = scmp.eq.s32.totalorder %s1367_s22, 1  ;;  %p622_p5 = scmp.ge.s32.totalorder %s984_s20, 1 }
   0xc   : > { %p1076_p4 = por %p1364_p1, %p59_p0  ;;  %p175_p7 = scmp.lt.s32.totalorder %s984_s20, 3 }
   0xd   : > { %p1081_p6 = por %p112_p3, %p59_p0  ;;  %s986_s26 = smov [#allocation5]  }
   0xe   : > { %s1368_s23 = scalar_select %p1076_p4, 1, 0 }
   0xf   : > { %s1369_s24 = scalar_select %p1081_p6, 1, 0 }
  0x10   : > { %p1086_p8 = pnand %p622_p5, %p175_p7  ;;  %s187_s27 = sshll.u32 %s986_s26, 4  ;;  %s188_s27 = int_to_ptr.vmem [resolvable:$true] %s187_s27 }
  0x11   : > { %s37_s29 = sadd.s32 1, %s980_s19  ;;  %s780_s6 = scalar_lea.hbm %s1360_s1, 512 }
  0x12   : > { %s1370_s25 = scalar_select %p1086_p8, 1, 0 }
  0x13   : > { %p691_p9 = pneg %p1086_p8  ;;  %p781_p12 = scmp.ne.s32.totalorder %s1360_s1, %s780_s6 }
  0x14   : > { %p787_p5 = scmp.lt.u32.totalorder %s780_s6, %s1360_s1 }
  0x15   : > { %p1095_p11 = pnand %p691_p9, %p1364_p1 }
  0x17   : > { %p782_p13 = pneg %p1095_p11 }
  0x19   : > { %p783_p0 = pnand %p782_p13, %p781_p12 }
  0x1b   : > { %p784_p3 = pneg %p783_p0 }
  0x1d   : > { %p789_p7 = pnand %p787_p5, %p784_p3 }
  0x1f   : > { %792 = shalt.err (!%p789_p7)
}
  0x20   : > { %s793_s11 = scalar_lea.vmem %s188_s27, 512  ;;  %p801_p2 = scmp.lt.s32.totalorder %s188_s27, %s188_s27 }
  0x21   : > { %p794_p9 = scmp.ne.s32.totalorder %s188_s27, %s793_s11  ;;  %p802_p6 = scmp.lt.s32.totalorder %s793_s11, %s793_s11 }
  0x23   : > { %p796_p10 = pnand %p794_p9, %p782_p13  ;;  %p803_p4 = por %p802_p6, %p801_p2 }
  0x25   : > { %p797_p1 = pneg %p796_p10 }
  0x27   : > { %p804_p8 = pnand %p803_p4, %p797_p1 }
  0x29   : > { %807 = shalt.err (!%p804_p8)
}
  0x2a   : > { %s987_s12 = smov 128   ;;  %s988_s13 = smov 8  }
  0x2b   : > { %694 = dma.hbm_to_vmem [thread:$0]  (!%p1095_p11), %s1360_s1, 512, %s188_s27, [#allocation6], %s987_s12, %s987_s12, %s988_s13  }
  0x2c   : > { %p39_p1 = scmp.ge.s32.totalorder %s37_s29, 2  ;;  %s46_s30 = sadd.s32 1, %s972_s17 }
  0x2d   : > { %p53_p2 = scmp.ne.s32.totalorder %s972_s17, %s968_s16  ;;  %p54_p4 = scmp.eq.s32.totalorder %s984_s20, 0 }
  0x2e   : > { %s1390_s29 = smov (%p39_p1, %s37_s29), 0  ;;  %p1373_p8 = scmp.eq.s32.totalorder %s1065_s21, 1 }
  0x2f   : > { %p1122_p6 = por %p54_p4, %p53_p2  ;;  %s41_s28 = ssub.s32 %s980_s19, %s1390_s29 }
  0x30   : > { %p1128_p10 = por %p1373_p8, %p53_p2  ;;  %p710_p12 = scmp.lt.s32.totalorder %s984_s20, 2 }
  0x31   : > { %p44_p11 = scmp.eq.s32.totalorder %s41_s28, 0  ;;  %s201_s27 = sand.u32 1, %s972_s17  }
  0x32   : > { %s625_s7 = sshll.u32 %s201_s27, 3  ;;  %s626_s9 = sshll.u32 %s980_s19, 7 }
  0x33   : > { %s1137_s8 = scalar_select %p44_p11, %s972_s17, %s46_s30  }
  0x34   : > { %s1143_s12 = scalar_lea.hbm %s1359_s0, %s626_s9  ;;  %s205_s13 = scalar_lea.vmem [#allocation2], %s625_s7 }
  0x35   : > { %s213_s14 = sshll.u32 %s205_s13, 4  ;;  %p1149_p13 = pnand %p710_p12, %p1122_p6  ;;  %s1145_s14 = int_to_ptr.vmem [resolvable:$true] %s213_s14 }
  0x36   : > { %s202_s30 = scalar_lea.sflag [#allocation3], %s201_s27  ;;  %s808_s28 = scalar_lea.hbm %s1143_s12, 128 }
  0x37   : > { %p809_p0 = scmp.ne.s32.totalorder %s1143_s12, %s808_s28  ;;  %p810_p3 = pneg %p1149_p13 }
  0x38   : > { %s813_s10 = scalar_lea.hbm %s1359_s0, 256  ;;  %p814_p9 = scmp.lt.u32.totalorder %s1143_s12, %s1359_s0 }
  0x39   : > { %p811_p5 = pnand %p810_p3, %p809_p0  ;;  %p815_p1 = scmp.lt.u32.totalorder %s813_s10, %s808_s28 }
  0x3a   : > { %p817_p4 = scmp.lt.u32.totalorder %s808_s28, %s1143_s12 }
  0x3b   : > { %p812_p7 = pneg %p811_p5  ;;  %p816_p2 = por %p815_p1, %p814_p9 }
  0x3d   : > { %p818_p6 = por %p817_p4, %p816_p2 }
  0x3f   : > { %p819_p8 = pnand %p818_p6, %p812_p7 }
  0x41   : > { %822 = shalt.err (!%p819_p8)
}
  0x42   : > { %s823_s27 = scalar_lea.vmem %s1145_s14, 128  ;;  %s989_s13 = smov [#allocation2]  }
  0x43   : > { %p824_p12 = scmp.ne.s32.totalorder %s1145_s14, %s823_s27  ;;  %s828_s7 = sshll.u32 %s989_s13, 4  ;;  %s829_s7 = int_to_ptr.vmem [resolvable:$false] %s828_s7 }
  0x44   : > { %s830_s9 = scalar_lea.vmem %s829_s7, 256  ;;  %p831_p5 = scmp.lt.s32.totalorder %s1145_s14, %s829_s7 }
  0x45   : > { %p826_p11 = pnand %p824_p12, %p810_p3  ;;  %p832_p9 = scmp.lt.s32.totalorder %s830_s9, %s823_s27 }
  0x47   : > { %p827_p0 = pneg %p826_p11  ;;  %p833_p1 = por %p832_p9, %p831_p5 }
  0x49   : > { %p834_p2 = pnand %p833_p1, %p827_p0 }
  0x4b   : > { %837 = shalt.err (!%p834_p2)
}
  0x4c   : > { %698 = dma.hbm_to_vmem [thread:$0]  (!%p1149_p13), %s1143_s12, 128, %s1145_s14, %s202_s30  }
  0x4d   : > { %p1376_p7 = scmp.ne.s32.totalorder %s1370_s25, 0 }
  0x4e   : > { %s1181_s28 = sand.u32 (!%p1376_p7), 1, %s968_s16   ;;  %p1377_p3 = scmp.ne.s32.totalorder (!%p1376_p7), %s1368_s23, 0 }
  0x4f   : > { %222 = sbr.rel (%p1376_p7) target bundleno = 493 (0x1ed), region = 28  ;;  %s628_s10 = sshll.u32 (!%p1376_p7), %s1181_s28, 3 }
  0x50   : > { %s225_s5 = scalar_lea.sflag (!%p1376_p7), [#allocation3], %s1181_s28  ;;  %s228_s11 = scalar_lea.vmem (!%p1376_p7), [#allocation2], %s628_s10 }
  0x56   : > { %947 = dma.done.wait (%p1377_p3), %s225_s5, 128  }
  0x57   : > { %949 = vsyncadd (%p1377_p3), %s225_s5, 4294967168  ;;  %p1378_p4 = scmp.eq.s32.totalorder %s1065_s21, 0 }
  0x59   : > { %951 = dma.done.wait (%p1378_p4), [#allocation6], 512   ;;  %p1379_p13 = pmov %p1378_p4 }
  0x5a   : > { %v990_v0 = vmov 0.0|0.0   ;;  %vm991_vm0 = vmmov 0   ;;  %v992_v1 = vmov 0.0   ;;  %v268_v2 = vld [vmem:[#allocation5] sm:$0xff]  ;;  %v269_v3 = vld [vmem:[#allocation5 + $0x8] sm:$0xff]  ;;  %v270_v4 = vld [vmem:[#allocation5 + $0x10] sm:$0xff] }
  0x5b   : > { %953 = vsyncadd (%p1379_p13), [#allocation6], 4294966784  ;;  %673 = vmatprep.subr.bf16.mxu0 %v990_v0  ;;  %670 = vmatprep.mubr.msk.f32.mxu0 %vm991_vm0, %v992_v1  ;;  %v674_v5 = vpack.c.bf16 %v269_v3, %v268_v2  ;;  %v271_v6 = vld [vmem:[#allocation5 + $0x18] sm:$0xff]  ;;  %vm272_vm1 = vcmask 261120   ;;  %s1194_s23 = sshll.u32 %s1181_s28, 5  ;;  %vm346_vm2 = vcmask 64512  }
  0x5c   : > { %v677_v7 = vpack.c.bf16 %v271_v6, %v270_v4  ;;  %v267_v8 = vld [vmem:[%s228_s11] sm:$0xff]  ;;  %s993_s25 = smov 80   ;;  %s994_s12 = smov 96  }
  0x5d   : > { %675 = vmatpush3.bf16.msra.mxu0 %v674_v5  ;;  %s1197_s14 = scalar_lea.vmem [#allocation7], %s1194_s23  ;;  %s995_s26 = smov 72  }
  0x5e   : > { %676 = vmatprep.subr.bf16.mxu0 %v990_v0  ;;  %s996_s30 = smov 88   ;;  %s997_s27 = smov 120  }
  0x5f   : > { %s998_s13 = smov 64   ;;  %s999_s7 = smov 112  }
  0x60   : > { %s1000_s9 = smov 56   ;;  %s1001_s10 = smov 104  }
  0x61   : > { %678 = vmatpush3.bf16.msra.mxu0 %v677_v7  ;;  %s1002_s5 = smov 48   ;;  %s1003_s11 = smov 40  }
  0x64   : > { %671 = vmatmul.mubr.msk.f32.vlgmr.msra.gmra.mrb[0].mxu0 %vm272_vm1, %v267_v8 }
 0x137   : > { %v342_v9 = vpop.f32.mrb[0].mxu0 }
 0x138   : > { %377 = vrot.lane.b32.xlu1 %v342_v9, %s993_s25  ;;  %349 = vrot.lane.b32.xlu0 %v342_v9, %s994_s12  ;;  %v672_v10 = vpop.f32.mrb[1].mxu0  ;;  %347 = vst.msk [vmem:[%s1197_s14] sm:$0xff] %vm346_vm2, %v342_v9  ;;  %s259_s25 = scalar_lea.vmem [#allocation8], %s1194_s23 }
 0x139   : > { %s444_s12 = sshll.u32 %s259_s25, 4  ;;  %s1206_s12 = int_to_ptr.vmem [resolvable:$true] %s444_s12 }
 0x13c   : > { %392 = vrot.lane.b32.xlu1 %v342_v9, %s995_s26  ;;  %362 = vrot.lane.b32.xlu0 %v342_v9, %s996_s30  ;;  %s407_s26 = sand.u32 1, %s1065_s21   ;;  %s1204_s30 = sshll.u32 %s976_s18, 9 }
 0x13d   : > { %s1218_s18 = scalar_lea.sflag [#allocation9], %s407_s26  ;;  %s838_s21 = scalar_lea.vmem %s1206_s12, 512 }
 0x13e   : > { %p839_p6 = scmp.ne.s32.totalorder %s1206_s12, %s838_s21 }
 0x140   : > { %357 = vrot.lane.b32.xlu1 %v342_v9, %s997_s27  ;;  %353 = vrot.lane.b32.xlu0 %v342_v9, %s998_s13  ;;  %p840_p8 = pnand %p839_p6, %p1128_p10 }
 0x142   : > { %p841_p12 = pneg %p840_p8 }
 0x144   : > { %372 = vrot.lane.b32.xlu1 %v342_v9, %s999_s7  ;;  %367 = vrot.lane.b32.xlu0 %v342_v9, %s1000_s9  ;;  %s1214_s7 = scalar_lea.hbm %s1362_s3, %s1204_s30  ;;  %s1004_s9 = smov [#allocation8]  }
 0x148   : > { %387 = vrot.lane.b32.xlu1 %v342_v9, %s1001_s10  ;;  %382 = vrot.lane.b32.xlu0 %v342_v9, %s1002_s5  ;;  %s842_s10 = sshll.u32 %s1004_s9, 4  ;;  %s843_s10 = int_to_ptr.vmem [resolvable:$false] %s842_s10 }
 0x149   : > { %s844_s5 = scalar_lea.vmem %s843_s10, 1024  ;;  %p845_p11 = scmp.lt.s32.totalorder %s1206_s12, %s843_s10 }
 0x14a   : > { %p846_p0 = scmp.lt.s32.totalorder %s844_s5, %s838_s21 }
 0x14c   : > { %397 = vrot.lane.b32.xlu0 %v342_v9, %s1003_s11  ;;  %p847_p5 = por %p846_p0, %p845_p11 }
 0x14e   : > { %p848_p9 = pnand %p847_p5, %p841_p12 }
 0x1aa   : > { %v378_v11 = vpop.permute.xlu1 %377  ;;  %v350_v12 = vpop.permute.xlu0 %349 }
 0x1ab   : > { %638 = vst.msk [vmem:[%s259_s25 + $0x10] sm:$0xff] %vm346_vm2, %v378_v11  ;;  %352 = vst.msk [vmem:[%s259_s25] sm:$0xff] %vm346_vm2, %v350_v12 }
 0x1ae   : > { %v393_v13 = vpop.permute.xlu1 %392  ;;  %v363_v14 = vpop.permute.xlu0 %362 }
 0x1af   : > { %641 = vst.msk [vmem:[%s259_s25 + $0x18] sm:$0xff] %vm346_vm2, %v393_v13  ;;  %635 = vst.msk [vmem:[%s259_s25 + $0x8] sm:$0xff] %vm346_vm2, %v363_v14 }
 0x1b0   : > { %851 = shalt.err (!%p848_p9)
}
 0x1b1   : > { %s852_s11 = scalar_lea.hbm %s1214_s7, 512  ;;  %s856_s27 = scalar_lea.hbm %s1362_s3, 1024 }
 0x1b2   : > { %p853_p1 = scmp.ne.s32.totalorder %s1214_s7, %s852_s11  ;;  %p857_p3 = scmp.lt.u32.totalorder %s1214_s7, %s1362_s3 }
 0x1b3   : > { %p858_p4 = scmp.lt.u32.totalorder %s856_s27, %s852_s11  ;;  %p860_p6 = scmp.lt.u32.totalorder %s852_s11, %s1214_s7 }
 0x1b4   : > { %p854_p2 = pnand %p853_p1, %p1128_p10 }
 0x1b5   : > { %p859_p13 = por %p858_p4, %p857_p3 }
 0x1b6   : > { %p855_p7 = pneg %p854_p2 }
 0x1b7   : > { %p861_p8 = por %p860_p6, %p859_p13 }
 0x1b9   : > { %p862_p12 = pnand %p861_p8, %p855_p7 }
 0x1bb   : > { %865 = shalt.err (!%p862_p12)
}
 0x1bc   : > { %s1005_s21 = smov 128   ;;  %s1006_s10 = smov 8   ;;  %v358_v15 = vpop.permute.xlu1 %357  ;;  %v354_v16 = vpop.permute.xlu0 %353 }
 0x1bd   : > { %686 = dma.vmem_to_hbm [thread:$0]  (%p1128_p10), %s1206_s12, 512, %s1214_s7, %s1218_s18, %s1005_s21, %s1005_s21, %s1006_s10  }
 0x1be   : > { %634 = vst.msk [vmem:[%s1197_s14 + $0x8] sm:$0xff] %vm346_vm2, %v358_v15  ;;  %s1248_s5 = scalar_lea.vmem [#allocation10], %s1194_s23  ;;  %s427_s11 = sshll.u32 %s1197_s14, 4  ;;  %s1257_s11 = int_to_ptr.vmem [resolvable:$true] %s427_s11 }
 0x1bf   : > { %356 = vst.msk [vmem:[%s1248_s5] sm:$0xff] %vm346_vm2, %v354_v16  ;;  %s1263_s23 = scalar_lea.hbm %s1361_s2, %s1204_s30  ;;  %s403_s26 = scalar_lea.sflag [#allocation4], %s1181_s28 }
 0x1c0   : > { %v373_v17 = vpop.permute.xlu1 %372  ;;  %v368_v18 = vpop.permute.xlu0 %367  ;;  %s866_s27 = scalar_lea.vmem %s1257_s11, 512  ;;  %s1007_s13 = smov [#allocation7]  }
 0x1c1   : > { %637 = vst.msk [vmem:[%s1197_s14 + $0x10] sm:$0xff] %vm346_vm2, %v373_v17  ;;  %636 = vst.msk [vmem:[%s1248_s5 + $0x8] sm:$0xff] %vm346_vm2, %v368_v18  ;;  %p867_p11 = scmp.ne.s32.totalorder %s1257_s11, %s866_s27  ;;  %s870_s9 = sshll.u32 %s1007_s13, 4  ;;  %s871_s9 = int_to_ptr.vmem [resolvable:$false] %s870_s9 }
 0x1c2   : > { %s872_s12 = scalar_lea.vmem %s871_s9, 1024  ;;  %p873_p9 = scmp.lt.s32.totalorder %s1257_s11, %s871_s9 }
 0x1c3   : > { %p868_p0 = pnand %p867_p11, %p1128_p10  ;;  %p874_p1 = scmp.lt.s32.totalorder %s872_s12, %s866_s27 }
 0x1c4   : > { %v388_v19 = vpop.permute.xlu1 %387  ;;  %v383_v20 = vpop.permute.xlu0 %382 }
 0x1c5   : > { %640 = vst.msk [vmem:[%s1197_s14 + $0x18] sm:$0xff] %vm346_vm2, %v388_v19  ;;  %639 = vst.msk [vmem:[%s1248_s5 + $0x10] sm:$0xff] %vm346_vm2, %v383_v20  ;;  %p869_p5 = pneg %p868_p0  ;;  %p875_p2 = por %p874_p1, %p873_p9 }
 0x1c7   : > { %p876_p7 = pnand %p875_p2, %p869_p5 }
 0x1c9   : > { %879 = shalt.err (!%p876_p7)
}
 0x1ca   : > { %s880_s14 = scalar_lea.hbm %s1263_s23, 512  ;;  %s884_s13 = scalar_lea.hbm %s1361_s2, 1024 }
 0x1cb   : > { %p881_p3 = scmp.ne.s32.totalorder %s1263_s23, %s880_s14  ;;  %p885_p6 = scmp.lt.u32.totalorder %s1263_s23, %s1361_s2 }
 0x1cc   : > { %p886_p8 = scmp.lt.u32.totalorder %s884_s13, %s880_s14  ;;  %p888_p11 = scmp.lt.u32.totalorder %s880_s14, %s1263_s23 }
 0x1cd   : > { %p882_p4 = pnand %p881_p3, %p1128_p10 }
 0x1ce   : > { %p887_p12 = por %p886_p8, %p885_p6 }
 0x1cf   : > { %p883_p13 = pneg %p882_p4 }
 0x1d0   : > { %p889_p0 = por %p888_p11, %p887_p12 }
 0x1d2   : > { %p890_p5 = pnand %p889_p0, %p883_p13 }
 0x1d4   : > { %893 = shalt.err (!%p890_p5)
}
 0x1d5   : > { %685 = dma.vmem_to_hbm [thread:$0]  (%p1128_p10), %s1257_s11, 512, %s1263_s23, %s403_s26, %s1005_s21, %s1005_s21, %s1006_s10   ;;  %v398_v21 = vpop.permute.xlu0 %397 }
 0x1d6   : > { %s1380_s22 = sshll.u32 %s1248_s5, 4  ;;  %s1305_s12 = scalar_lea.hbm %s1363_s4, %s1204_s30  ;;  %642 = vst.msk [vmem:[%s1248_s5 + $0x18] sm:$0xff] %vm346_vm2, %v398_v21  ;;  %s1299_s22 = int_to_ptr.vmem [resolvable:$true] %s1380_s22 }
 0x1d7   : > { %s894_s28 = scalar_lea.vmem %s1299_s22, 512  ;;  %s1008_s11 = smov [#allocation10]  }
 0x1d8   : > { %p895_p9 = scmp.ne.s32.totalorder %s1299_s22, %s894_s28  ;;  %s898_s23 = sshll.u32 %s1008_s11, 4  ;;  %s899_s23 = int_to_ptr.vmem [resolvable:$false] %s898_s23 }
 0x1d9   : > { %s900_s26 = scalar_lea.vmem %s899_s23, 1024  ;;  %p901_p7 = scmp.lt.s32.totalorder %s1299_s22, %s899_s23 }
 0x1da   : > { %p896_p1 = pnand %p895_p9, %p1128_p10  ;;  %p902_p3 = scmp.lt.s32.totalorder %s900_s26, %s894_s28 }
 0x1dc   : > { %p897_p2 = pneg %p896_p1  ;;  %p903_p4 = por %p902_p3, %p901_p7 }
 0x1de   : > { %p904_p13 = pnand %p903_p4, %p897_p2 }
 0x1e0   : > { %907 = shalt.err (!%p904_p13)
}
 0x1e1   : > { %s908_s30 = scalar_lea.hbm %s1305_s12, 512  ;;  %s912_s7 = scalar_lea.hbm %s1363_s4, 1024 }
 0x1e2   : > { %p909_p6 = scmp.ne.s32.totalorder %s1305_s12, %s908_s30  ;;  %p913_p11 = scmp.lt.u32.totalorder %s1305_s12, %s1363_s4 }
 0x1e3   : > { %p914_p0 = scmp.lt.u32.totalorder %s912_s7, %s908_s30  ;;  %p916_p9 = scmp.lt.u32.totalorder %s908_s30, %s1305_s12 }
 0x1e4   : > { %p910_p8 = pnand %p909_p6, %p1128_p10 }
 0x1e5   : > { %p915_p5 = por %p914_p0, %p913_p11 }
 0x1e6   : > { %p911_p12 = pneg %p910_p8 }
 0x1e7   : > { %p917_p1 = por %p916_p9, %p915_p5 }
 0x1e9   : > { %p918_p2 = pnand %p917_p1, %p911_p12 }
 0x1eb   : > { %921 = shalt.err (!%p918_p2)
}
 0x1ec   : > { %687 = dma.vmem_to_hbm [thread:$0]  (%p1128_p10), %s1299_s22, 512, %s1305_s12, %s1218_s18, %s1005_s21, %s1005_s21, %s1006_s10  }
 0x1ed PF: > { %s476_s25 = sand.u32 1, %s964_s15   ;;  %p1381_p7 = scmp.ne.s32.totalorder %s1369_s24, 0 }
 0x1ee   : > { %p1382_p3 = scmp.ge.s32.totalorder %s984_s20, 2  ;;  %s477_s27 = scalar_lea.sflag [#allocation4], %s476_s25 }
 0x1f0   : > { %p700_p4 = pnand %p1382_p3, %p1381_p7 }
 0x1f2   : > { %955 = dma.done.wait (!%p700_p4), %s477_s27, 512  }
 0x1f3   : > { %957 = vsyncadd (!%p700_p4), %s477_s27, 4294966784  ;;  %s1383_s6 = sadd.s32 4294967294, %s984_s20  }
 0x1f4   : > { %s485_s28 = sand.u32 1, %s1383_s6  }
 0x1f5   : > { %s486_s11 = scalar_lea.sflag [#allocation9], %s485_s28 }
 0x1f6   : > { %959 = dma.done.wait (!%p700_p4), %s486_s11, 1024  }
 0x1f7   : > { %961 = vsyncadd (!%p700_p4), %s486_s11, 4294966272  ;;  %s25_s20 = sadd.s32 1, %s984_s20   ;;  %s1384_s15 = smov %s968_s16 }
 0x1f8   : > { %p22_p10 = scmp.ge.s32.totalorder %s25_s20, 4   ;;  %s1385_s16 = smov %s972_s17 }
 0x1f9   : > { %s1386_s17 = smov %s1137_s8  ;;  %s1387_s18 = smov %s980_s19 }
 0x1fa   : > { %s1388_s19 = smov %s1390_s29  ;;  %24 = sbr.rel (!%p22_p10) target bundleno = 9 (0x9), region = 118 }
 0x201   :  { %500 = vsyncpa [#allocation3], 1 }
 0x202   :  { %502 = vsyncpa [#allocation3 + $0x1], 1 }
 0x203   :  { %503 = vsyncpa [#allocation6], 1 }
 0x204   :  { %504 = vsyncpa [#allocation4], 1 }
 0x205   :  { %506 = vsyncpa [#allocation4 + $0x1], 1 }
 0x206   :  { %507 = vsyncpa [#allocation9], 1 }
 0x207   :  { %509 = vsyncpa [#allocation9 + $0x1], 1 }

</bundles_post_ra>
